<compile_context>
chip_gen: v5e
topology: v5e:2x2
jax: 0.10.0
libtpu: 0.0.40
codegen_flags: <defaults>
</compile_context>

<pallas_src>
import jax
import jax.numpy as jnp
from jax.experimental import pallas as pl
from jax.experimental.pallas import tpu as pltpu


def mlp_kernel(x_ref, w13t_ref, w2t_ref, o_ref, acc_ref):
    """One (token-tile, I-slab) step of out = (silu(x@W1^T) * (x@W3^T)) @ W2^T.

    Grid: (T // tm, I // ti). Token axis is "parallel" (Megacore); the I axis is
    the reduction: the output block is constant over k, acc_ref accumulates.

      x_ref:    (tm, D)     token tile
      w13t_ref: (D, 2*ti)   fused slab [W1^T slab_k | W3^T slab_k]
      w2t_ref:  (ti, D)     W2^T slab_k
      o_ref:    (tm, D)     output tile
      acc_ref:  (tm, D)     f32 scratch accumulator
    """
    k = pl.program_id(1)

    @pl.when(k == 0)
    def _():
        acc_ref[...] = jnp.zeros_like(acc_ref)

    x = x_ref[...]

    # Fused up-projection: one MXU matmul covers both W1 and W3 (f32 accumulate).
    h = jnp.dot(x, w13t_ref[...], preferred_element_type=jnp.float32)
    ti = w13t_ref.shape[1] // 2
    h1 = h[:, :ti]
    h3 = h[:, ti:]

    # SiLU gate in f32 (VPU muls; exp + reciprocal land on the EUP slot).
    # Elementwise in I, so applying it per I-slab before the partial down
    # projection is exact.
    gate = h1 * pl.reciprocal(1.0 + jnp.exp(-h1))
    gated = gate * h3

    # Partial down-projection for this I-slab, accumulated in f32.
    acc_ref[...] += jnp.dot(gated.astype(w2t_ref.dtype), w2t_ref[...],
                            preferred_element_type=jnp.float32)

    @pl.when(k == pl.num_programs(1) - 1)
    def _():
        # RowParallelLinear's dist.all_reduce is identity at world size 1.
        o_ref[...] = acc_ref[...].astype(o_ref.dtype)


def _round_up(n, m):
    return ((n + m - 1) // m) * m


def _tile_bytes(tm, ti, D, itemsize):
    """Double-buffered x / weight slabs / out tile + f32 accumulator."""
    per_step = (tm * D) + (D * 2 * ti) + (ti * D) + (tm * D)
    return 2 * per_step * itemsize + tm * D * 4


def _choose_ti(I, D, tm, itemsize, ti_max, vmem_budget):
    """Largest divisor of I that is <= ti_max and fits the VMEM budget."""
    divisors = sorted((d for d in range(1, I + 1) if I % d == 0), reverse=True)
    for d in divisors:
        if d <= ti_max and _tile_bytes(tm, d, D, itemsize) <= vmem_budget:
            return d
    # Nothing fits (huge D): fall back to the smallest divisor.
    return divisors[-1]


def mlp_forward(x_tokens, w1, w2, w3, *, tm=256, ti_max=512,
                vmem_budget=44 << 20):
    """x_tokens: [T, dim]; w1/w3: [inter, dim]; w2: [dim, inter] (PyTorch layout).

    tm:          token tile target (clamped to the problem, multiple of 8).
    ti_max:      upper bound for the intermediate-dim slab.
    vmem_budget: working-set budget used to pick ti; 44 MiB is safe on v7x
                 (64 MiB physical) and leaves headroom on v5e/v6e (128 MiB).
    """
    T, D = x_tokens.shape
    I = w1.shape[0]
    itemsize = jnp.dtype(x_tokens.dtype).itemsize

    # Token tiling: clamp tm to the (8-rounded) token count and pad T so any
    # token count works; padded rows are zero and sliced off at the end.
    tm = min(tm, _round_up(T, 8))
    T_pad = _round_up(T, tm)
    if T_pad != T:
        x_tokens = jnp.pad(x_tokens, ((0, T_pad - T), (0, 0)))

    # Intermediate-dim slab chosen to fit the VMEM budget (v7x-safe).
    ti = _choose_ti(I, D, tm, itemsize, min(ti_max, I), vmem_budget)
    nk = I // ti

    # Glue: pre-transpose, and fuse W1^T/W3^T so block k's columns are
    # [W1^T[:, slab_k] | W3^T[:, slab_k]]  -> a single (D, 2*ti) matmul per step.
    w1t = jnp.transpose(w1)  # (D, I)
    w3t = jnp.transpose(w3)  # (D, I)
    w13t = jnp.concatenate(
        [w1t.reshape(D, nk, ti), w3t.reshape(D, nk, ti)], axis=2
    ).reshape(D, 2 * I)
    w2t = jnp.transpose(w2)  # (I, D)

    vmem_needed = _tile_bytes(tm, ti, D, itemsize)
    vmem_limit = int(min(max(int(vmem_needed * 1.25) + (2 << 20), 32 << 20),
                         60 << 20))

    out = pl.pallas_call(
        mlp_kernel,
        out_shape=jax.ShapeDtypeStruct((T_pad, D), x_tokens.dtype),
        grid_spec=pltpu.PrefetchScalarGridSpec(
            num_scalar_prefetch=0,
            grid=(T_pad // tm, nk),  # (token tiles: parallel, I slabs: reduction)
            in_specs=[
                pl.BlockSpec((tm, D), lambda i, k: (i, 0)),       # x tile
                pl.BlockSpec((D, 2 * ti), lambda i, k: (0, k)),   # [W1^T|W3^T] slab
                pl.BlockSpec((ti, D), lambda i, k: (k, 0)),       # W2^T slab
            ],
            out_specs=pl.BlockSpec((tm, D), lambda i, k: (i, 0)),
            scratch_shapes=[pltpu.VMEM((tm, D), jnp.float32)],
        ),
        compiler_params=pltpu.CompilerParams(
            dimension_semantics=("parallel", "arbitrary"),
            vmem_limit_bytes=vmem_limit),
    )(x_tokens, w13t, w2t)

    return out[:T] if T_pad != T else out


def mlp_reference(x_tokens, w1, w2, w3):
    h1 = x_tokens @ w1.T
    h3 = x_tokens @ w3.T
    return (jax.nn.silu(h1) * h3) @ w2.T


if __name__ == "__main__":
    # Small shapes consistent with the module's forward.
    batch, seq, dim, inter_dim = 2, 8, 32, 64

    key = jax.random.PRNGKey(0)
    kx, k1, k2, k3 = jax.random.split(key, 4)

    x = jax.random.normal(kx, (batch, seq, dim), dtype=jnp.float32)
    # Deterministic params (PyTorch Linear weight layout: [out, in]).
    w1 = jax.random.normal(k1, (inter_dim, dim), dtype=jnp.float32) * 0.05
    w2 = jax.random.normal(k2, (dim, inter_dim), dtype=jnp.float32) * 0.05
    w3 = jax.random.normal(k3, (inter_dim, dim), dtype=jnp.float32) * 0.05

    x_tokens = x.reshape(batch * seq, dim)  # [T, D]
    ref = mlp_reference(x_tokens, w1, w2, w3)

    # f32 path: tight correctness check.
    out_f32 = jax.block_until_ready(mlp_forward(x_tokens, w1, w2, w3))
    assert out_f32.shape == ref.shape
    assert jnp.allclose(out_f32, ref, atol=1e-5, rtol=1e-5), "f32 mismatch vs reference"

    # bf16 path (preferred dtype for v6e/v7x MXU throughput): looser check.
    bf = jnp.bfloat16
    out_bf16 = jax.block_until_ready(
        mlp_forward(x_tokens.astype(bf), w1.astype(bf), w2.astype(bf), w3.astype(bf)))
    assert jnp.allclose(out_bf16.astype(jnp.float32), ref, atol=1e-2, rtol=1e-2), \
        "bf16 mismatch vs reference"

    # Non-divisible token count exercises the padding path.
    out_odd = jax.block_until_ready(mlp_forward(x_tokens[:11], w1, w2, w3))
    assert jnp.allclose(out_odd, ref[:11], atol=1e-5, rtol=1e-5), "padded-T mismatch"

    print("KERNEL_OK")
</pallas_src>

<mosaic_0001>
module attributes {stable_mosaic.version = 11 : i64} {
  func.func @mlp_kernel(%arg0: i32, %arg1: i32, %arg2: memref<16x32xf32, #tpu.memory_space<vmem>>, %arg3: memref<32x128xf32, #tpu.memory_space<vmem>>, %arg4: memref<64x32xf32, #tpu.memory_space<vmem>>, %arg5: memref<16x32xf32, #tpu.memory_space<vmem>>, %arg6: memref<16x32xf32, #tpu.memory_space<vmem>>) attributes {dimension_semantics = [#tpu.dimension_semantics<parallel>, #tpu.dimension_semantics<arbitrary>], iteration_bounds = array<i64: 1, 1>, scalar_prefetch = 0 : i64, scratch_operands = 1 : i64, tpu.core_type = #tpu.core_type<tc>, window_params = [{transform_indices = @transform_0, window_bounds = array<i64: 16, 32>}, {transform_indices = @transform_1, window_bounds = array<i64: 32, 128>}, {transform_indices = @transform_2, window_bounds = array<i64: 64, 32>}, {transform_indices = @transform_3, window_bounds = array<i64: 16, 32>}]} {
    %c0_i32 = arith.constant 0 : i32
    %0 = arith.cmpi eq, %arg1, %c0_i32 : i32
    %1 = arith.extui %0 : i1 to i32
    %c0_i32_0 = arith.constant 0 : i32
    %2 = arith.cmpi ne, %1, %c0_i32_0 : i32
    scf.if %2 {
      %cst_15 = arith.constant 0.000000e+00 : f32
      %24 = vector.broadcast %cst_15 : f32 to vector<16x32xf32>
      %c0_16 = arith.constant 0 : index
      %c0_17 = arith.constant 0 : index
      %25 = vector.load %arg6[%c0_16, %c0_17] : memref<16x32xf32, #tpu.memory_space<vmem>>, vector<16x32xf32>
      tpu.vector_store %arg6[%c0_16, %c0_17], %24 {strides = array<i32>} : memref<16x32xf32, #tpu.memory_space<vmem>>, vector<16x32xf32>,
    } else {
    }
    %c0 = arith.constant 0 : index
    %c0_1 = arith.constant 0 : index
    %3 = vector.load %arg2[%c0, %c0_1] : memref<16x32xf32, #tpu.memory_space<vmem>>, vector<16x32xf32>
    %c0_2 = arith.constant 0 : index
    %c0_3 = arith.constant 0 : index
    %4 = vector.load %arg3[%c0_2, %c0_3] : memref<32x128xf32, #tpu.memory_space<vmem>>, vector<32x128xf32>
    %cst = arith.constant dense<0.000000e+00> : vector<16x128xf32>
    %5 = tpu.matmul %3, %4, %cst {dimension_numbers = #tpu.dot_dimension_numbers<[1], [0], [0], [1], [0, 0, 1, 1], [], []>} : vector<16x32xf32>, vector<32x128xf32>, vector<16x128xf32> -> vector<16x128xf32>
    %6 = vector.extract_strided_slice %5 {offsets = [0, 0], sizes = [16, 64], strides = [1, 1]} : vector<16x128xf32> to vector<16x64xf32>
    %7 = vector.extract_strided_slice %5 {offsets = [0, 64], sizes = [16, 64], strides = [1, 1]} : vector<16x128xf32> to vector<16x64xf32>
    %cst_4 = arith.constant 0.000000e+00 : f32
    %8 = vector.broadcast %cst_4 : f32 to vector<16x64xf32>
    %9 = arith.subf %8, %6 : vector<16x64xf32>
    %10 = math.exp %9 : vector<16x64xf32>
    %cst_5 = arith.constant 1.000000e+00 : f32
    %11 = vector.broadcast %cst_5 : f32 to vector<16x64xf32>
    %12 = arith.addf %11, %10 : vector<16x64xf32>
    %13 = tpu.reciprocal %12 : vector<16x64xf32> -> vector<16x64xf32>
    %14 = arith.mulf %6, %13 : vector<16x64xf32>
    %15 = arith.mulf %14, %7 : vector<16x64xf32>
    %c0_6 = arith.constant 0 : index
    %c0_7 = arith.constant 0 : index
    %16 = vector.load %arg6[%c0_6, %c0_7] : memref<16x32xf32, #tpu.memory_space<vmem>>, vector<16x32xf32>
    %c0_8 = arith.constant 0 : index
    %c0_9 = arith.constant 0 : index
    %17 = vector.load %arg4[%c0_8, %c0_9] : memref<64x32xf32, #tpu.memory_space<vmem>>, vector<64x32xf32>
    %cst_10 = arith.constant dense<0.000000e+00> : vector<16x32xf32>
    %18 = tpu.matmul %15, %17, %cst_10 {dimension_numbers = #tpu.dot_dimension_numbers<[1], [0], [0], [1], [0, 0, 1, 1], [], []>} : vector<16x64xf32>, vector<64x32xf32>, vector<16x32xf32> -> vector<16x32xf32>
    %19 = arith.addf %16, %18 : vector<16x32xf32>
    %c0_11 = arith.constant 0 : index
    %c0_12 = arith.constant 0 : index
    %20 = vector.load %arg6[%c0_11, %c0_12] : memref<16x32xf32, #tpu.memory_space<vmem>>, vector<16x32xf32>
    tpu.vector_store %arg6[%c0_11, %c0_12], %19 {strides = array<i32>} : memref<16x32xf32, #tpu.memory_space<vmem>>, vector<16x32xf32>,
    %c0_i32_13 = arith.constant 0 : i32
    %21 = arith.cmpi eq, %arg1, %c0_i32_13 : i32
    %22 = arith.extui %21 : i1 to i32
    %c0_i32_14 = arith.constant 0 : i32
    %23 = arith.cmpi ne, %22, %c0_i32_14 : i32
    scf.if %23 {
      %c0_15 = arith.constant 0 : index
      %c0_16 = arith.constant 0 : index
      %24 = vector.load %arg6[%c0_15, %c0_16] : memref<16x32xf32, #tpu.memory_space<vmem>>, vector<16x32xf32>
      %c0_17 = arith.constant 0 : index
      %c0_18 = arith.constant 0 : index
      %25 = vector.load %arg5[%c0_17, %c0_18] : memref<16x32xf32, #tpu.memory_space<vmem>>, vector<16x32xf32>
      tpu.vector_store %arg5[%c0_17, %c0_18], %24 {strides = array<i32>} : memref<16x32xf32, #tpu.memory_space<vmem>>, vector<16x32xf32>,
    } else {
    }
    return
  }
  func.func @transform_0(%arg0: i32, %arg1: i32) -> (i32, i32) {
    %c0_i32 = arith.constant 0 : i32
    %c0_i32_0 = arith.constant 0 : i32
    return %arg0, %c0_i32 : i32, i32
  }
  func.func @transform_1(%arg0: i32, %arg1: i32) -> (i32, i32) {
    %c0_i32 = arith.constant 0 : i32
    %c0_i32_0 = arith.constant 0 : i32
    return %c0_i32, %arg1 : i32, i32
  }
  func.func @transform_2(%arg0: i32, %arg1: i32) -> (i32, i32) {
    %c0_i32 = arith.constant 0 : i32
    %c0_i32_0 = arith.constant 0 : i32
    return %arg1, %c0_i32 : i32, i32
  }
  func.func @transform_3(%arg0: i32, %arg1: i32) -> (i32, i32) {
    %c0_i32 = arith.constant 0 : i32
    %c0_i32_0 = arith.constant 0 : i32
    return %arg0, %c0_i32 : i32, i32
  }
}

</mosaic_0001>

<bundles_post_ra>
// kernel: tpu_custom_call.1
= control target key start
LH: loop header
LB: loop body
LE: loop exit
PB: predicated region body
PF: predicated region fallthrough
CT: control target
= control target key end

     0   :  { %s313_s0 = inlined_call_operand.vmem [shape: f32[16,32], index: 0, kind: input, shape index: {}]   ;;  %s314_s1 = inlined_call_operand.vmem [shape: f32[32,128], index: 1, kind: input, shape index: {}]   ;;  %s315_s2 = inlined_call_operand.vmem [shape: f32[64,32], index: 2, kind: input, shape index: {}]   ;;  %s316_s3 = inlined_call_operand.hbm [shape: f32[16,32], index: 3, kind: output, shape index: {}]  }
   0x1   :  { %v27_v0 = vld [vmem:[%s314_s1 + $0x18] sm:$0xff]  ;;  %v26_v1 = vld [vmem:[%s314_s1 + $0x10] sm:$0xff]  ;;  %v25_v2 = vld [vmem:[%s314_s1 + $0x8] sm:$0xff] }
   0x2   :  { %47 = vmatpush.msra.mxu0 %v27_v0  ;;  %179 = vmatpush.msra.mxu3 %v27_v0 }
   0x3   :  { %8 = vsyncpa [#allocation4], 0  ;;  %v24_v3 = vld [vmem:[%s314_s1] sm:$0xff]  ;;  %vm19_vm0 = vcmask 261120   ;;  %v23_v5 = vld [vmem:[%s313_s0 + $0x8] sm:$0xff]  ;;  %s230_s27 = smov 64  }
   0x4   :  { %48 = vmatpush.msra.mxu0 %v26_v1  ;;  %180 = vmatpush.msra.mxu3 %v26_v1  ;;  %v22_v4 = vld [vmem:[%s313_s0] sm:$0xff]  ;;  %v115_v6 = vld [vmem:[%s315_s2 + $0x38] sm:$0xff]  ;;  %v114_v7 = vld [vmem:[%s315_s2 + $0x30] sm:$0xff]  ;;  %v231_v26 = vmov 0.0   ;;  %vm116_vm8 = vcmask 523264   ;;  %s163_s15 = sshll.u32 %s316_s3, 4  ;;  %s164_s15 = int_to_ptr.hbm [resolvable:$true] %s163_s15 }
   0x5   :  { %183 = vmatpush.msra.mxu2 %v115_v6  ;;  %131 = vmatpush.msra.mxu1 %v115_v6  ;;  %v113_v9 = vld [vmem:[%s315_s2 + $0x28] sm:$0xff]  ;;  %v112_v10 = vld [vmem:[%s315_s2 + $0x20] sm:$0xff]  ;;  %v111_v11 = vld [vmem:[%s315_s2 + $0x18] sm:$0xff]  ;;  %21 = vst.msk [vmem:[#allocation2 + $0x8] sm:$0xff] %vm19_vm0, %v231_v26  ;;  %s233_s16 = smov 128   ;;  %s234_s17 = smov 8  }
   0x6   :  { %49 = vmatpush.msra.mxu0 %v25_v2  ;;  %181 = vmatpush.msra.mxu3 %v25_v2  ;;  %v110_v12 = vld [vmem:[%s315_s2 + $0x10] sm:$0xff]  ;;  %v109_v14 = vld [vmem:[%s315_s2 + $0x8] sm:$0xff]  ;;  %v108_v22 = vld [vmem:[%s315_s2] sm:$0xff]  ;;  %20 = vst.msk [vmem:[#allocation2] sm:$0xff] %vm19_vm0, %v231_v26  ;;  %s232_s2 = smov [#allocation3]  }
   0x7   :  { %184 = vmatpush.msra.mxu2 %v114_v7  ;;  %132 = vmatpush.msra.mxu1 %v114_v7  ;;  %s161_s12 = sshll.u32 %s232_s2, 4  ;;  %s162_s12 = int_to_ptr.vmem [resolvable:$true] %s161_s12 }
   0x8   :  { %50 = vmatpush.msra.mxu0 %v24_v3  ;;  %182 = vmatpush.msra.mxu3 %v24_v3 }
   0x9   :  { %175 = vmatmul.msk.f32.vlgmr.msra.gmra.mxu0 %vm19_vm0, %v22_v4  ;;  %176 = vmatmul.msk.f32.vlgmr.msra.gmra.mxu3 %vm19_vm0, %v23_v5 }
   0xa   :  { %185 = vmatpush.msra.mxu2 %v113_v9  ;;  %133 = vmatpush.msra.mxu1 %v113_v9 }
   0xc   :  { %186 = vmatpush.msra.mxu2 %v112_v10  ;;  %134 = vmatpush.msra.mxu1 %v112_v10  ;;  %v107_v51 = vld [vmem:[#allocation2 + $0x8] sm:$0xff] }
   0xd   :  { %v106_v53 = vld [vmem:[#allocation2] sm:$0xff] }
   0xe   :  { %187 = vmatpush.msra.mxu2 %v111_v11  ;;  %135 = vmatpush.msra.mxu1 %v111_v11 }
  0x10   :  { %188 = vmatpush.msra.mxu2 %v110_v12  ;;  %136 = vmatpush.msra.mxu1 %v110_v12 }
  0x12   :  { %189 = vmatpush.msra.mxu2 %v109_v14  ;;  %137 = vmatpush.msra.mxu1 %v109_v14 }
  0x14   :  { %190 = vmatpush.msra.mxu2 %v108_v22  ;;  %138 = vmatpush.msra.mxu1 %v108_v22 }
  0x86   :  { %v52_v13 = vpop.f32.mrf.mxu0 }
  0x87   :  { %v58_v17 = vsub.f32 0.0, %v52_v13 }
  0x89   :  { %v60_v18 = vmul.f32 1.442695, %v58_v17 }
  0x8c   :  { %v281_v8 = vpop.f32.mrf.mxu3 }
  0x8d   :  { %100 = vrot.lane.b32.xlu0 %v281_v8, %s230_s27  ;;  %v59_v15 = vsub.f32 0.0, %v281_v8 }
  0x8f   :  { %v62_v16 = vmul.f32 1.442695, %v59_v15 }
  0x91   :  { %196 = vpow2.f32 %v62_v16 }
  0x92   :  { %198 = vpow2.f32 %v60_v18 }
  0x95   :  { %98 = vrot.lane.b32.xlu0 %v52_v13, %s230_s27 }
  0x97   :  { %v197_v19 = vpop.eup %196 }
  0x98   :  { %v65_v20 = vadd.f32 1.0, %v197_v19  ;;  %v199_v21 = vpop.eup %198 }
  0x99   :  { %v64_v23 = vadd.f32 1.0, %v199_v21 }
  0x9a   :  { %200 = vrcp.f32 %v65_v20  ;;  %v91_v33 = vand.u32 2147483648, %v65_v20  ;;  %vm85_vm2 = vweird.f32 %v65_v20  ;;  %v89_v34 = vand.u32 2147483647, %v65_v20 }
  0x9b   :  { %202 = vrcp.f32 %v64_v23  ;;  %vm71_vm4 = vweird.f32 %v64_v23  ;;  %v77_v38 = vand.u32 2147483648, %v64_v23  ;;  %v75_v41 = vand.u32 2147483647, %v64_v23 }
  0x9c   :  { %v92_v37 = vor.u32 1.1754944e-38, %v91_v33  ;;  %vm90_vm6 = vcmp.eq.f32.partialorder %v89_v34, 8.507059e+37 }
  0x9d   :  { %v78_v43 = vor.u32 1.1754944e-38, %v77_v38  ;;  %vm76_vm9 = vcmp.eq.f32.partialorder %v75_v41, 8.507059e+37 }
  0xa0   :  { %v201_v24 = vpop.eup %200 }
  0xa1   :  { %v81_v25 = vmul.f32 %v201_v24, %v65_v20  ;;  %v203_v28 = vpop.eup %202  ;;  %vm86_vm1 = vweird.f32 %v201_v24 }
  0xa2   :  { %v67_v29 = vmul.f32 %v203_v28, %v64_v23  ;;  %vm87_vm3 = vmor %vm85_vm2, %vm86_vm1  ;;  %vm72_vm5 = vweird.f32 %v203_v28 }
  0xa3   :  { %v82_v27 = vsub.f32 1.0, %v81_v25  ;;  %vm73_vm7 = vmor %vm71_vm4, %vm72_vm5 }
  0xa4   :  { %v68_v31 = vsub.f32 1.0, %v67_v29 }
  0xa5   :  { %v83_v30 = vmul.f32 %v201_v24, %v82_v27 }
  0xa6   :  { %v69_v35 = vmul.f32 %v203_v28, %v68_v31 }
  0xa7   :  { %v84_v32 = vadd.f32 %v201_v24, %v83_v30 }
  0xa8   :  { %v70_v40 = vadd.f32 %v203_v28, %v69_v35 }
  0xa9   :  { %v88_v36 = vsel %vm87_vm3, %v201_v24, %v84_v32 }
  0xaa   :  { %v93_v39 = vsel %vm90_vm6, %v92_v37, %v88_v36  ;;  %v74_v45 = vsel %vm73_vm7, %v203_v28, %v70_v40 }
  0xab   :  { %v95_v42 = vmul.f32 %v93_v39, %v281_v8  ;;  %v79_v47 = vsel %vm76_vm9, %v78_v43, %v74_v45 }
  0xac   :  { %v94_v48 = vmul.f32 %v79_v47, %v52_v13 }
  0xff   :  { %v101_v44 = vpop.permute.xlu0 %100 }
 0x100   :  { %v105_v46 = vmul.f32 %v101_v44, %v95_v42 }
 0x102   :  { %178 = vmatmul.msk.f32.vlgmr.msra.gmra.mxu2 %vm116_vm8, %v105_v46 }
 0x107   :  { %v99_v49 = vpop.permute.xlu0 %98 }
 0x108   :  { %v104_v50 = vmul.f32 %v99_v49, %v94_v48 }
 0x10a   :  { %177 = vmatmul.msk.f32.vlgmr.msra.gmra.mxu1 %vm116_vm8, %v104_v50 }
 0x185   :  { %v143_v52 = vpop.f32.mrf.mxu2 }
 0x186   :  { %v147_v54 = vadd.f32 %v143_v52, %v107_v51 }
 0x187   :  { %v140_v55 = vpop.f32.mrf.mxu1 }
 0x188   :  { %149 = vst.msk [vmem:[#allocation2 + $0x8] sm:$0xff] %vm19_vm0, %v147_v54  ;;  %v146_v56 = vadd.f32 %v140_v55, %v106_v53 }
 0x18a   :  { %148 = vst.msk [vmem:[#allocation2] sm:$0xff] %vm19_vm0, %v146_v56 }
 0x18f   :  { %v154_v57 = vld [vmem:[#allocation2 + $0x8] sm:$0xff] }
 0x190   :  { %156 = vst.msk [vmem:[#allocation3 + $0x8] sm:$0xff] %vm19_vm0, %v154_v57 }
 0x191   :  { %v153_v58 = vld [vmem:[#allocation2] sm:$0xff] }
 0x192   :  { %155 = vst.msk [vmem:[#allocation3] sm:$0xff] %vm19_vm0, %v153_v58 }
 0x193   :  { %169 = dma.vmem_to_hbm [thread:$0]  %s162_s12, 256, %s164_s15, [#allocation4], %s233_s16, %s233_s16, %s234_s17  }
 0x194   :  { %228 = dma.done.wait [#allocation4], 256  }
 0x195   :  { %229 = vsyncadd [#allocation4], 4294967040 }
 0x196   :  { %174 = vsyncpa [#allocation4], 1 }

</bundles_post_ra>
